<compile_context>
chip_gen: v5e
topology: v5e:2x2
jax: 0.10.0
libtpu: 0.0.40
codegen_flags: <defaults>
</compile_context>

<pallas_src>
import jax
import jax.numpy as jnp
from jax.experimental import pallas as pl
from jax.experimental.pallas import tpu as pltpu


_LANE = 128      # lane width (last dim)
_SUBLANE = 8     # sublane width (second-to-last dim)


def _round_up(x, m):
    return ((x + m - 1) // m) * m


def _classifier_kernel(x_ref, w1_ref, b1_ref, w2_ref, b2_ref, o_ref, h_ref):
    # x_ref : (tm, K1p)   VMEM   padded input activations
    # w1_ref: (K1p, N1p)  VMEM   (g1/||V1||) * V1.T, zero-padded  (scale pre-folded)
    # b1_ref: (1, N1p)    VMEM
    # w2_ref: (N1p, N2p)  VMEM   (g2/||V2||) * V2.T, zero-padded
    # b2_ref: (1, N2p)    VMEM
    # o_ref : (tm, N2p)   VMEM   logits
    # h_ref : (tm, N1p)   VMEM scratch for the intermediate activation (never leaves VMEM)
    h = jnp.dot(x_ref[...], w1_ref[...], preferred_element_type=jnp.float32)
    h_ref[...] = jnp.maximum(h + b1_ref[...], 0.0)
    # TODO(synk): nn.Dropout between the layers is identity at inference; training-mode stochastic
    # masking is not implemented here.
    y = jnp.dot(h_ref[...], w2_ref[...], preferred_element_type=jnp.float32)
    o_ref[...] = (y + b2_ref[...]).astype(o_ref.dtype)


def init_simple_classifier_params(key, in_dim, hid_dim, out_dim):
    """Raw PyTorch-style params: [(V, g, b)] per layer; g = ||V||_F (weight_norm dim=None init)."""
    params = []
    for d_in, d_out in ((in_dim, hid_dim), (hid_dim, out_dim)):
        key, kv, kb = jax.random.split(key, 3)
        bound = 1.0 / (d_in ** 0.5)
        v = jax.random.uniform(kv, (d_out, d_in), jnp.float32, -bound, bound)
        g = jnp.sqrt(jnp.sum(v ** 2))                       # scalar -> W_eff == V at init
        b = jax.random.uniform(kb, (d_out,), jnp.float32, -bound, bound)
        params.append((v, g, b))
    return params


def prepare_params(raw_params):
    """Fold the weight-norm scale into pre-transposed, lane-padded weights (done once, off hot path)."""
    def fold(v, g, b):
        d_out, d_in = v.shape
        scale = g / jnp.sqrt(jnp.sum(v.astype(jnp.float32) ** 2))
        wt = (scale * v.astype(jnp.float32)).T              # (d_in, d_out), scale folded in
        kp = _round_up(d_in, _LANE)
        npad = _round_up(d_out, _LANE)
        wt_p = jnp.zeros((kp, npad), jnp.float32).at[:d_in, :d_out].set(wt)
        b_p = jnp.zeros((1, npad), jnp.float32).at[0, :d_out].set(b.astype(jnp.float32))
        return wt_p, b_p, d_in, d_out

    (v1, g1, b1), (v2, g2, b2) = raw_params
    w1t, b1p, in_dim, hid_dim = fold(v1, g1, b1)
    w2t, b2p, _, out_dim = fold(v2, g2, b2)
    return {
        "w1t": w1t, "b1": b1p, "w2t": w2t, "b2": b2p,
        "in_dim": in_dim, "hid_dim": hid_dim, "out_dim": out_dim,
    }


def simple_classifier_forward(x, prepared):
    """logits = (ReLU(x @ W1_eff.T + b1)) @ W2_eff.T + b2 — fused in one Pallas kernel."""
    w1t, b1 = prepared["w1t"], prepared["b1"]
    w2t, b2 = prepared["w2t"], prepared["b2"]
    in_dim, out_dim = prepared["in_dim"], prepared["out_dim"]

    B = x.shape[0]
    k1p, n1p = w1t.shape
    k2p, n2p = w2t.shape
    assert n1p == k2p and x.shape[1] == in_dim

    # Batch tile: multiple of the 8-row sublane, up to 128; pad batch to a whole number of tiles.
    tm = min(128, _round_up(B, _SUBLANE))
    bp = _round_up(B, tm)
    xp = jnp.zeros((bp, k1p), jnp.float32).at[:B, :in_dim].set(x.astype(jnp.float32))

    out_padded = pl.pallas_call(
        _classifier_kernel,
        out_shape=jax.ShapeDtypeStruct((bp, n2p), jnp.float32),
        grid_spec=pltpu.PrefetchScalarGridSpec(
            num_scalar_prefetch=0,
            grid=(bp // tm,),
            in_specs=[
                pl.BlockSpec((tm, k1p), lambda i: (i, 0)),     # x tile
                pl.BlockSpec((k1p, n1p), lambda i: (0, 0)),    # W1_eff.T (resident)
                pl.BlockSpec((1, n1p), lambda i: (0, 0)),      # b1
                pl.BlockSpec((k2p, n2p), lambda i: (0, 0)),    # W2_eff.T (resident)
                pl.BlockSpec((1, n2p), lambda i: (0, 0)),      # b2
            ],
            out_specs=pl.BlockSpec((tm, n2p), lambda i: (i, 0)),
            scratch_shapes=[pltpu.VMEM((tm, n1p), jnp.float32)],   # intermediate activation
        ),
        compiler_params=pltpu.CompilerParams(
            dimension_semantics=("parallel",),                 # batch tiles are independent
        ),
    )(xp, w1t, b1, w2t, b2)

    return out_padded[:B, :out_dim]


if __name__ == "__main__":
    key = jax.random.PRNGKey(0)
    in_dim, hid_dim, out_dim = 64, 128, 32     # small SimpleClassifier(in, hid, out, dropout)
    batch = 4
    dropout = 0.5                               # identity at inference

    key, kx = jax.random.split(key)
    x = jax.random.normal(kx, (batch, in_dim), jnp.float32)

    raw_params = init_simple_classifier_params(key, in_dim, hid_dim, out_dim)
    prepared = prepare_params(raw_params)

    out = simple_classifier_forward(x, prepared)
    out = jax.block_until_ready(out)

    # Reference in plain JAX (same math, no Pallas, no padding).
    (v1, g1, b1), (v2, g2, b2) = raw_params
    w1_eff = g1 * v1 / jnp.sqrt(jnp.sum(v1 ** 2))
    w2_eff = g2 * v2 / jnp.sqrt(jnp.sum(v2 ** 2))
    ref = jnp.maximum(x @ w1_eff.T + b1, 0.0) @ w2_eff.T + b2

    assert out.shape == (batch, out_dim)
    assert jnp.allclose(out, ref, atol=1e-4, rtol=1e-4)

    print("KERNEL_OK")
</pallas_src>

<mosaic_0001>
module attributes {stable_mosaic.version = 11 : i64} {
  func.func @_classifier_kernel(%arg0: i32, %arg1: memref<8x128xf32, #tpu.memory_space<vmem>>, %arg2: memref<128x128xf32, #tpu.memory_space<vmem>>, %arg3: memref<1x128xf32, #tpu.memory_space<vmem>>, %arg4: memref<128x128xf32, #tpu.memory_space<vmem>>, %arg5: memref<1x128xf32, #tpu.memory_space<vmem>>, %arg6: memref<8x128xf32, #tpu.memory_space<vmem>>, %arg7: memref<8x128xf32, #tpu.memory_space<vmem>>) attributes {dimension_semantics = [#tpu.dimension_semantics<parallel>], iteration_bounds = array<i64: 1>, scalar_prefetch = 0 : i64, scratch_operands = 1 : i64, tpu.core_type = #tpu.core_type<tc>, window_params = [{transform_indices = @transform_0, window_bounds = array<i64: 8, 128>}, {pipeline_mode = #tpu.pipeline_mode<synchronous>, transform_indices = @transform_1, window_bounds = array<i64: 128, 128>}, {pipeline_mode = #tpu.pipeline_mode<synchronous>, transform_indices = @transform_2, window_bounds = array<i64: 1, 128>}, {pipeline_mode = #tpu.pipeline_mode<synchronous>, transform_indices = @transform_3, window_bounds = array<i64: 128, 128>}, {pipeline_mode = #tpu.pipeline_mode<synchronous>, transform_indices = @transform_4, window_bounds = array<i64: 1, 128>}, {transform_indices = @transform_5, window_bounds = array<i64: 8, 128>}]} {
    %c0 = arith.constant 0 : index
    %c0_0 = arith.constant 0 : index
    %0 = vector.load %arg1[%c0, %c0_0] : memref<8x128xf32, #tpu.memory_space<vmem>>, vector<8x128xf32>
    %c0_1 = arith.constant 0 : index
    %c0_2 = arith.constant 0 : index
    %1 = vector.load %arg2[%c0_1, %c0_2] : memref<128x128xf32, #tpu.memory_space<vmem>>, vector<128x128xf32>
    %cst = arith.constant dense<0.000000e+00> : vector<8x128xf32>
    %2 = tpu.matmul %0, %1, %cst {dimension_numbers = #tpu.dot_dimension_numbers<[1], [0], [0], [1], [0, 0, 1, 1], [], []>} : vector<8x128xf32>, vector<128x128xf32>, vector<8x128xf32> -> vector<8x128xf32>
    %c0_3 = arith.constant 0 : index
    %c0_4 = arith.constant 0 : index
    %3 = vector.load %arg3[%c0_3, %c0_4] : memref<1x128xf32, #tpu.memory_space<vmem>>, vector<1x128xf32>
    %4 = vector.broadcast %3 : vector<1x128xf32> to vector<8x128xf32>
    %5 = arith.addf %2, %4 : vector<8x128xf32>
    %cst_5 = arith.constant 0.000000e+00 : f32
    %6 = vector.broadcast %cst_5 : f32 to vector<8x128xf32>
    %7 = arith.maximumf %5, %6 : vector<8x128xf32>
    %c0_6 = arith.constant 0 : index
    %c0_7 = arith.constant 0 : index
    %8 = vector.load %arg7[%c0_6, %c0_7] : memref<8x128xf32, #tpu.memory_space<vmem>>, vector<8x128xf32>
    tpu.vector_store %arg7[%c0_6, %c0_7], %7 {strides = array<i32>} : memref<8x128xf32, #tpu.memory_space<vmem>>, vector<8x128xf32>,
    %c0_8 = arith.constant 0 : index
    %c0_9 = arith.constant 0 : index
    %9 = vector.load %arg7[%c0_8, %c0_9] : memref<8x128xf32, #tpu.memory_space<vmem>>, vector<8x128xf32>
    %c0_10 = arith.constant 0 : index
    %c0_11 = arith.constant 0 : index
    %10 = vector.load %arg4[%c0_10, %c0_11] : memref<128x128xf32, #tpu.memory_space<vmem>>, vector<128x128xf32>
    %cst_12 = arith.constant dense<0.000000e+00> : vector<8x128xf32>
    %11 = tpu.matmul %9, %10, %cst_12 {dimension_numbers = #tpu.dot_dimension_numbers<[1], [0], [0], [1], [0, 0, 1, 1], [], []>} : vector<8x128xf32>, vector<128x128xf32>, vector<8x128xf32> -> vector<8x128xf32>
    %c0_13 = arith.constant 0 : index
    %c0_14 = arith.constant 0 : index
    %12 = vector.load %arg5[%c0_13, %c0_14] : memref<1x128xf32, #tpu.memory_space<vmem>>, vector<1x128xf32>
    %13 = vector.broadcast %12 : vector<1x128xf32> to vector<8x128xf32>
    %14 = arith.addf %11, %13 : vector<8x128xf32>
    %c0_15 = arith.constant 0 : index
    %c0_16 = arith.constant 0 : index
    %15 = vector.load %arg6[%c0_15, %c0_16] : memref<8x128xf32, #tpu.memory_space<vmem>>, vector<8x128xf32>
    tpu.vector_store %arg6[%c0_15, %c0_16], %14 {strides = array<i32>} : memref<8x128xf32, #tpu.memory_space<vmem>>, vector<8x128xf32>,
    return
  }
  func.func @transform_0(%arg0: i32) -> (i32, i32) {
    %c0_i32 = arith.constant 0 : i32
    %c0_i32_0 = arith.constant 0 : i32
    return %arg0, %c0_i32 : i32, i32
  }
  func.func @transform_1(%arg0: i32) -> (i32, i32) {
    %c0_i32 = arith.constant 0 : i32
    %c0_i32_0 = arith.constant 0 : i32
    %c0_i32_1 = arith.constant 0 : i32
    return %c0_i32, %c0_i32_0 : i32, i32
  }
  func.func @transform_2(%arg0: i32) -> (i32, i32) {
    %c0_i32 = arith.constant 0 : i32
    %c0_i32_0 = arith.constant 0 : i32
    %c0_i32_1 = arith.constant 0 : i32
    return %c0_i32, %c0_i32_0 : i32, i32
  }
  func.func @transform_3(%arg0: i32) -> (i32, i32) {
    %c0_i32 = arith.constant 0 : i32
    %c0_i32_0 = arith.constant 0 : i32
    %c0_i32_1 = arith.constant 0 : i32
    return %c0_i32, %c0_i32_0 : i32, i32
  }
  func.func @transform_4(%arg0: i32) -> (i32, i32) {
    %c0_i32 = arith.constant 0 : i32
    %c0_i32_0 = arith.constant 0 : i32
    %c0_i32_1 = arith.constant 0 : i32
    return %c0_i32, %c0_i32_0 : i32, i32
  }
  func.func @transform_5(%arg0: i32) -> (i32, i32) {
    %c0_i32 = arith.constant 0 : i32
    %c0_i32_0 = arith.constant 0 : i32
    return %arg0, %c0_i32 : i32, i32
  }
}

</mosaic_0001>

<bundles_post_ra>
// kernel: tpu_custom_call.1
= control target key start
LH: loop header
LB: loop body
LE: loop exit
PB: predicated region body
PF: predicated region fallthrough
CT: control target
= control target key end

     0   :  { %10 = vsyncpa [#allocation4], 0  ;;  %s333_s0 = inlined_call_operand.hbm [shape: f32[8,128], index: 0, kind: input, shape index: {}]   ;;  %s334_s1 = inlined_call_operand.hbm [shape: f32[128,128], index: 1, kind: input, shape index: {}]   ;;  %s335_s2 = inlined_call_operand.vmem [shape: f32[1,128], index: 2, kind: input, shape index: {}]   ;;  %s336_s3 = inlined_call_operand.hbm [shape: f32[128,128], index: 3, kind: input, shape index: {}]   ;;  %s337_s4 = inlined_call_operand.vmem [shape: f32[1,128], index: 4, kind: input, shape index: {}]   ;;  %s338_s5 = inlined_call_operand.hbm [shape: f32[8,128], index: 5, kind: output, shape index: {}]  }
   0x1   :  { %11 = vsyncpa [#allocation7], 0  ;;  %s28_s20 = sshll.u32 %s334_s1, 4  ;;  %s29_s20 = int_to_ptr.hbm [resolvable:$true] %s28_s20 }
   0x2   :  { %12 = vsyncpa [#allocation5], 0  ;;  %s279_s21 = smov [#allocation6]   ;;  %s18_s25 = sshll.u32 %s333_s0, 4  ;;  %s19_s25 = int_to_ptr.hbm [resolvable:$true] %s18_s25 }
   0x3   :  { %s30_s22 = sshll.u32 %s279_s21, 4  ;;  %s280_s26 = smov 128   ;;  %s31_s22 = int_to_ptr.vmem [resolvable:$true] %s30_s22 }
   0x4   :  { %s281_s27 = smov 8   ;;  %s282_s28 = smov [#allocation3]  }
   0x5   :  { %36 = dma.hbm_to_vmem [thread:$0]  %s29_s20, 2048, %s31_s22, [#allocation7], %s280_s26, %s280_s26, %s281_s27  }
   0x6   :  { %s20_s29 = sshll.u32 %s282_s28, 4  ;;  %s43_s7 = sshll.u32 %s336_s3, 4  ;;  %s21_s29 = int_to_ptr.vmem [resolvable:$true] %s20_s29  ;;  %s44_s7 = int_to_ptr.hbm [resolvable:$true] %s43_s7 }
   0x7   :  { %23 = dma.hbm_to_vmem [thread:$0]  %s19_s25, 128, %s21_s29, [#allocation4]  }
   0x8   :  { %s283_s1 = smov [#allocation8]  }
   0x9   :  { %s45_s8 = sshll.u32 %s283_s1, 4  ;;  %s46_s8 = int_to_ptr.vmem [resolvable:$true] %s45_s8 }
   0xa   :  { %51 = dma.hbm_to_vmem [thread:$0]  %s44_s7, 2048, %s46_s8, [#allocation7], %s280_s26, %s280_s26, %s281_s27  }
   0xb   :  { %273 = dma.done.wait [#allocation4], 128  }
   0xc   :  { %274 = vsyncadd [#allocation4], 4294967168 }
   0xd   :  { %275 = dma.done.wait [#allocation7], 4096  }
   0xe   :  { %276 = vsyncadd [#allocation7], 4294963200  ;;  %v82_v0 = vld [vmem:[#allocation6 + $0x78] sm:$0xff]  ;;  %v81_v1 = vld [vmem:[#allocation6 + $0x70] sm:$0xff]  ;;  %s284_s11 = smov [#allocation9]   ;;  %s158_s15 = sshll.u32 %s338_s5, 4  ;;  %s159_s15 = int_to_ptr.hbm [resolvable:$true] %s158_s15 }
   0xf   :  { %87 = vmatpush.msra.mxu0 %v82_v0  ;;  %v80_v2 = vld [vmem:[#allocation6 + $0x68] sm:$0xff]  ;;  %v79_v3 = vld [vmem:[#allocation6 + $0x60] sm:$0xff]  ;;  %v125_v4 = vld [vmem:[#allocation8 + $0x78] sm:$0xff]  ;;  %s156_s12 = sshll.u32 %s284_s11, 4  ;;  %s157_s12 = int_to_ptr.vmem [resolvable:$true] %s156_s12 }
  0x10   :  { %v78_v5 = vld [vmem:[#allocation6 + $0x58] sm:$0xff]  ;;  %130 = vmatpush.msra.mxu1 %v125_v4  ;;  %v124_v6 = vld [vmem:[#allocation8 + $0x70] sm:$0xff]  ;;  %v123_v7 = vld [vmem:[#allocation8 + $0x68] sm:$0xff] }
  0x11   :  { %88 = vmatpush.msra.mxu0 %v81_v1  ;;  %v77_v8 = vld [vmem:[#allocation6 + $0x50] sm:$0xff]  ;;  %v122_v9 = vld [vmem:[#allocation8 + $0x60] sm:$0xff]  ;;  %v76_v10 = vld [vmem:[#allocation6 + $0x48] sm:$0xff] }
  0x12   :  { %131 = vmatpush.msra.mxu1 %v124_v6  ;;  %v121_v11 = vld [vmem:[#allocation8 + $0x58] sm:$0xff]  ;;  %v75_v12 = vld [vmem:[#allocation6 + $0x40] sm:$0xff]  ;;  %v120_v13 = vld [vmem:[#allocation8 + $0x50] sm:$0xff] }
  0x13   :  { %89 = vmatpush.msra.mxu0 %v80_v2  ;;  %v74_v14 = vld [vmem:[#allocation6 + $0x38] sm:$0xff]  ;;  %v119_v15 = vld [vmem:[#allocation8 + $0x48] sm:$0xff]  ;;  %v73_v16 = vld [vmem:[#allocation6 + $0x30] sm:$0xff] }
  0x14   :  { %132 = vmatpush.msra.mxu1 %v123_v7  ;;  %v118_v17 = vld [vmem:[#allocation8 + $0x40] sm:$0xff]  ;;  %v72_v18 = vld [vmem:[#allocation6 + $0x28] sm:$0xff]  ;;  %v117_v19 = vld [vmem:[#allocation8 + $0x38] sm:$0xff] }
  0x15   :  { %90 = vmatpush.msra.mxu0 %v79_v3  ;;  %v71_v20 = vld [vmem:[#allocation6 + $0x20] sm:$0xff]  ;;  %v116_v21 = vld [vmem:[#allocation8 + $0x30] sm:$0xff]  ;;  %v70_v22 = vld [vmem:[#allocation6 + $0x18] sm:$0xff] }
  0x16   :  { %133 = vmatpush.msra.mxu1 %v122_v9  ;;  %v115_v23 = vld [vmem:[#allocation8 + $0x28] sm:$0xff]  ;;  %v69_v24 = vld [vmem:[#allocation6 + $0x10] sm:$0xff]  ;;  %v114_v25 = vld [vmem:[#allocation8 + $0x20] sm:$0xff] }
  0x17   :  { %91 = vmatpush.msra.mxu0 %v78_v5  ;;  %v68_v26 = vld [vmem:[#allocation6 + $0x8] sm:$0xff]  ;;  %v113_v27 = vld [vmem:[#allocation8 + $0x18] sm:$0xff]  ;;  %v67_v28 = vld [vmem:[#allocation6] sm:$0xff] }
  0x18   :  { %134 = vmatpush.msra.mxu1 %v121_v11  ;;  %v66_v29 = vld [vmem:[#allocation3] sm:$0xff]  ;;  %v112_v30 = vld [vmem:[#allocation8 + $0x10] sm:$0xff]  ;;  %v111_v31 = vld [vmem:[#allocation8 + $0x8] sm:$0xff] }
  0x19   :  { %92 = vmatpush.msra.mxu0 %v77_v8  ;;  %v110_v32 = vld [vmem:[#allocation8] sm:$0xff]  ;;  %v175_v33 = vld [vmem:[%s335_s2] ss:$0 sm:$0xff] }
  0x1a   :  { %135 = vmatpush.msra.mxu1 %v120_v13  ;;  %v176_v37 = vld [vmem:[%s337_s4] ss:$0 sm:$0xff] }
  0x1b   :  { %93 = vmatpush.msra.mxu0 %v76_v10 }
  0x1c   :  { %136 = vmatpush.msra.mxu1 %v119_v15 }
  0x1d   :  { %94 = vmatpush.msra.mxu0 %v75_v12 }
  0x1e   :  { %137 = vmatpush.msra.mxu1 %v118_v17 }
  0x1f   :  { %95 = vmatpush.msra.mxu0 %v74_v14 }
  0x20   :  { %138 = vmatpush.msra.mxu1 %v117_v19 }
  0x21   :  { %96 = vmatpush.msra.mxu0 %v73_v16 }
  0x22   :  { %139 = vmatpush.msra.mxu1 %v116_v21 }
  0x23   :  { %97 = vmatpush.msra.mxu0 %v72_v18 }
  0x24   :  { %140 = vmatpush.msra.mxu1 %v115_v23 }
  0x25   :  { %98 = vmatpush.msra.mxu0 %v71_v20 }
  0x26   :  { %141 = vmatpush.msra.mxu1 %v114_v25 }
  0x27   :  { %99 = vmatpush.msra.mxu0 %v70_v22 }
  0x28   :  { %142 = vmatpush.msra.mxu1 %v113_v27 }
  0x29   :  { %100 = vmatpush.msra.mxu0 %v69_v24 }
  0x2a   :  { %143 = vmatpush.msra.mxu1 %v112_v30 }
  0x2b   :  { %101 = vmatpush.msra.mxu0 %v68_v26 }
  0x2c   :  { %144 = vmatpush.msra.mxu1 %v111_v31 }
  0x2d   :  { %102 = vmatpush.msra.mxu0 %v67_v28 }
  0x2e   :  { %103 = vmatmul.f32.vlgmr.msra.gmra.mxu0 %v66_v29  ;;  %145 = vmatpush.msra.mxu1 %v110_v32 }
  0xab   :  { %v104_v34 = vpop.f32.mrf.mxu0 }
  0xac   :  { %v105_v35 = vadd.f32 %v175_v33, %v104_v34 }
  0xae   :  { %v107_v36 = vmax.f32 %v105_v35, 0.0 }
  0xb0   :  { %146 = vmatmul.f32.vlgmr.msra.gmra.mxu1 %v107_v36 }
 0x12d   :  { %v147_v38 = vpop.f32.mrf.mxu1 }
 0x12e   :  { %v148_v39 = vadd.f32 %v176_v37, %v147_v38 }
 0x130   :  { %150 = vst [vmem:[#allocation9] sm:$0xff] %v148_v39 }
 0x131   :  { %161 = dma.vmem_to_hbm [thread:$0]  %s157_s12, 128, %s159_s15, [#allocation5]  }
 0x132   :  { %277 = dma.done.wait [#allocation5], 128  }
 0x133   :  { %278 = vsyncadd [#allocation5], 4294967168 }
 0x134   :  { %166 = vsyncpa [#allocation4], 1 }
 0x135   :  { %167 = vsyncpa [#allocation7], 1 }
 0x136   :  { %168 = vsyncpa [#allocation5], 1 }

</bundles_post_ra>
